<compile_context>
chip_gen: v5e
topology: v5e:2x2
jax: 0.10.0
libtpu: 0.0.40
codegen_flags: <defaults>
</compile_context>

<pallas_src>
from functools import partial

import jax
import jax.numpy as jnp
from jax.experimental import pallas as pl
from jax.experimental.pallas import tpu as pltpu


# ---------------------------------------------------------------------------
# Kernels
# ---------------------------------------------------------------------------
def _butterfly(x_ref):
    """Shared partial sums for all four (row-parity, col-parity) outputs."""
    f32 = jnp.float32
    x1 = x_ref[0].astype(f32)
    x2 = x_ref[1].astype(f32)
    x3 = x_ref[2].astype(f32)
    x4 = x_ref[3].astype(f32)
    a = (x1 - x2) * 0.5
    b = (x4 - x3) * 0.5
    c = (x1 + x2) * 0.5
    d = (x3 + x4) * 0.5
    # (row parity r, col parity s):
    #   (0,0)=a+b  (0,1)=c-d  (1,0)=a-b  (1,1)=c+d
    return a + b, c - d, a - b, c + d


def _iwt_kernel_fused(x_ref, o_ref):
    """x_ref: (4, bm, W); o_ref: (bm, 2, 2W) with columns fully interleaved."""
    ee, eo, oe, oo = _butterfly(x_ref)
    bm, w = ee.shape

    def interleave(left, right):
        # left[:, j] -> column 2j, right[:, j] -> column 2j+1 (VPU/XLU only).
        return jnp.stack([left, right], axis=-1).reshape(bm, 2 * w)

    o_ref[:, 0, :] = interleave(ee, eo)   # even output rows (2i)
    o_ref[:, 1, :] = interleave(oe, oo)   # odd output rows  (2i+1)


def _iwt_kernel_planes(x_ref, o_ref):
    """x_ref: (4, bm, W); o_ref: (bm, 2, 2, W) = (row parity, col parity, j)."""
    ee, eo, oe, oo = _butterfly(x_ref)
    o_ref[:, 0, 0, :] = ee
    o_ref[:, 0, 1, :] = eo
    o_ref[:, 1, 0, :] = oe
    o_ref[:, 1, 1, :] = oo


# ---------------------------------------------------------------------------
# Tiling
# ---------------------------------------------------------------------------
_TARGET_SUBBAND_ELEMS = 128 * 1024        # per-sub-band elems per block (~2 MiB f32 in)
_VMEM_LIMIT_BYTES = 32 * 1024 * 1024      # >= defaults on all gens, << capacity


def _pick_block_rows(rows, w, target_elems=_TARGET_SUBBAND_ELEMS):
    """Rows of the flattened (channel, image-row) axis per grid step."""
    max_bm = max(1, target_elems // max(w, 1))
    if rows <= max_bm:
        return rows                                   # full dim -> always legal
    return min(rows, max(8, (max_bm // 8) * 8))       # multiple of 8 (sublane rule)


# ---------------------------------------------------------------------------
# pallas_call wrapper
# ---------------------------------------------------------------------------
def _iwt_pallas(x, *, fused):
    B, C, H, W = x.shape
    oc = C // 4
    rows = oc * H                                     # flattened (channel, row) axis

    bm = _pick_block_rows(rows, W)
    n_blocks = pl.cdiv(rows, bm)
    # v7x megacore: try to expose >= 2 parallel grid slices.
    if B * n_blocks < 2 and rows > 8:
        half = (((rows + 1) // 2) + 7) // 8 * 8
        if half < rows:
            bm = half
            n_blocks = pl.cdiv(rows, bm)

    x_v = x.reshape(B, 4, rows, W)                    # free view of the channel axis
    grid = (B, n_blocks)
    in_specs = [pl.BlockSpec((None, 4, bm, W), lambda b, m: (b, 0, m, 0))]
    compiler_params = pltpu.CompilerParams(
        dimension_semantics=("parallel", "parallel"),
        vmem_limit_bytes=_VMEM_LIMIT_BYTES,
    )

    if fused:
        out = pl.pallas_call(
            _iwt_kernel_fused,
            out_shape=jax.ShapeDtypeStruct((B, rows, 2, 2 * W), jnp.float32),
            grid=grid,
            in_specs=in_specs,
            out_specs=pl.BlockSpec((None, bm, 2, 2 * W), lambda b, m: (b, m, 0, 0)),
            compiler_params=compiler_params,
        )(x_v)
        # out[b, c*H+i, r, 2j+s] == h[b, c, 2i+r, 2j+s]  -> free contiguous reshape.
        return out.reshape(B, oc, 2 * H, 2 * W)

    out = pl.pallas_call(
        _iwt_kernel_planes,
        out_shape=jax.ShapeDtypeStruct((B, rows, 2, 2, W), jnp.float32),
        grid=grid,
        in_specs=in_specs,
        out_specs=pl.BlockSpec((None, bm, 2, 2, W), lambda b, m: (b, m, 0, 0, 0)),
        compiler_params=compiler_params,
    )(x_v)
    # out[b, c*H+i, r, s, j] == h[b, c, 2i+r, 2j+s]: one XLA pass swaps (s, j)
    # so the final reshape is contiguous.
    out = out.reshape(B, oc, H, 2, 2, W).transpose(0, 1, 2, 3, 5, 4)
    return out.reshape(B, oc, 2 * H, 2 * W)


_IMPL_CACHE = {}


def _get_impl(shape, dtype):
    key = (tuple(shape), str(dtype))
    impl = _IMPL_CACHE.get(key)
    if impl is not None:
        return impl
    fused = jax.jit(partial(_iwt_pallas, fused=True))
    try:
        fused.lower(jax.ShapeDtypeStruct(tuple(shape), dtype)).compile()
        impl = fused
    except Exception:
        # TODO(synk): Mosaic rejected the in-kernel lane-interleave reshape for
        # this shape/version; fall back to plane-split kernel + one XLA pass.
        impl = jax.jit(partial(_iwt_pallas, fused=False))
    _IMPL_CACHE[key] = impl
    return impl


def iwt(x, garbage_param=None):
    """Pallas implementation of IWT.forward(x, garbage_param) (arg ignored)."""
    del garbage_param
    B, C, H, W = x.shape
    assert C % 4 == 0, "input channels must be divisible by 4"
    return _get_impl(x.shape, x.dtype)(x)


# ---------------------------------------------------------------------------
# Pure-JAX reference (matches PyTorch iwt_init exactly)
# ---------------------------------------------------------------------------
def iwt_ref(x):
    B, C, H, W = x.shape
    oc = C // 4
    x1 = x[:, 0 * oc:1 * oc].astype(jnp.float32) / 2
    x2 = x[:, 1 * oc:2 * oc].astype(jnp.float32) / 2
    x3 = x[:, 2 * oc:3 * oc].astype(jnp.float32) / 2
    x4 = x[:, 3 * oc:4 * oc].astype(jnp.float32) / 2
    h = jnp.zeros((B, oc, 2 * H, 2 * W), jnp.float32)
    h = h.at[:, :, 0::2, 0::2].set(x1 - x2 - x3 + x4)
    h = h.at[:, :, 1::2, 0::2].set(x1 - x2 + x3 - x4)
    h = h.at[:, :, 0::2, 1::2].set(x1 + x2 - x3 - x4)
    h = h.at[:, :, 1::2, 1::2].set(x1 + x2 + x3 + x4)
    return h


if __name__ == "__main__":
    key = jax.random.PRNGKey(0)
    kx, kg = jax.random.split(key)

    B, C, H, W = 2, 8, 16, 16              # -> output (2, 2, 32, 32)
    x = jax.random.normal(kx, (B, C, H, W), dtype=jnp.float32)
    # The module has no learned parameters; forward() takes an ignored arg.
    garbage_param = jax.random.normal(kg, (4,), dtype=jnp.float32)

    out = iwt(x, garbage_param)
    out = jax.block_until_ready(out)

    ref = iwt_ref(x)
    assert out.shape == (B, C // 4, 2 * H, 2 * W), out.shape
    assert out.dtype == jnp.float32
    assert jnp.allclose(out, ref, atol=1e-5, rtol=1e-5), "mismatch vs reference"

    print("KERNEL_OK")
</pallas_src>

<mosaic_0001>
module attributes {stable_mosaic.version = 11 : i64} {
  func.func @_iwt_kernel_planes(%arg0: i32, %arg1: i32, %arg2: memref<1x4x32x16xf32, #tpu.memory_space<vmem>>, %arg3: memref<1x32x2x2x16xf32, #tpu.memory_space<vmem>>) attributes {dimension_semantics = [#tpu.dimension_semantics<parallel>, #tpu.dimension_semantics<parallel>], iteration_bounds = array<i64: 2, 1>, scalar_prefetch = 0 : i64, scratch_operands = 0 : i64, tpu.core_type = #tpu.core_type<tc>, window_params = [{transform_indices = @transform_0, window_bounds = array<i64: 1, 4, 32, 16>}, {transform_indices = @transform_1, window_bounds = array<i64: 1, 32, 2, 2, 16>}]} {
    %c0 = arith.constant 0 : index
    %c0_0 = arith.constant 0 : index
    %c0_1 = arith.constant 0 : index
    %c0_2 = arith.constant 0 : index
    %0 = vector.load %arg2[%c0, %c0_0, %c0_1, %c0_2] : memref<1x4x32x16xf32, #tpu.memory_space<vmem>>, vector<1x1x32x16xf32>
    %1 = vector.shape_cast %0 : vector<1x1x32x16xf32> to vector<32x16xf32>
    %c0_3 = arith.constant 0 : index
    %c1 = arith.constant 1 : index
    %c0_4 = arith.constant 0 : index
    %c0_5 = arith.constant 0 : index
    %2 = vector.load %arg2[%c0_3, %c1, %c0_4, %c0_5] : memref<1x4x32x16xf32, #tpu.memory_space<vmem>>, vector<1x1x32x16xf32>
    %3 = vector.shape_cast %2 : vector<1x1x32x16xf32> to vector<32x16xf32>
    %c0_6 = arith.constant 0 : index
    %c2 = arith.constant 2 : index
    %c0_7 = arith.constant 0 : index
    %c0_8 = arith.constant 0 : index
    %4 = vector.load %arg2[%c0_6, %c2, %c0_7, %c0_8] : memref<1x4x32x16xf32, #tpu.memory_space<vmem>>, vector<1x1x32x16xf32>
    %5 = vector.shape_cast %4 : vector<1x1x32x16xf32> to vector<32x16xf32>
    %c0_9 = arith.constant 0 : index
    %c3 = arith.constant 3 : index
    %c0_10 = arith.constant 0 : index
    %c0_11 = arith.constant 0 : index
    %6 = vector.load %arg2[%c0_9, %c3, %c0_10, %c0_11] : memref<1x4x32x16xf32, #tpu.memory_space<vmem>>, vector<1x1x32x16xf32>
    %7 = vector.shape_cast %6 : vector<1x1x32x16xf32> to vector<32x16xf32>
    %8 = arith.subf %1, %3 : vector<32x16xf32>
    %cst = arith.constant 5.000000e-01 : f32
    %9 = vector.broadcast %cst : f32 to vector<32x16xf32>
    %10 = arith.mulf %8, %9 : vector<32x16xf32>
    %11 = arith.subf %7, %5 : vector<32x16xf32>
    %cst_12 = arith.constant 5.000000e-01 : f32
    %12 = vector.broadcast %cst_12 : f32 to vector<32x16xf32>
    %13 = arith.mulf %11, %12 : vector<32x16xf32>
    %14 = arith.addf %1, %3 : vector<32x16xf32>
    %cst_13 = arith.constant 5.000000e-01 : f32
    %15 = vector.broadcast %cst_13 : f32 to vector<32x16xf32>
    %16 = arith.mulf %14, %15 : vector<32x16xf32>
    %17 = arith.addf %5, %7 : vector<32x16xf32>
    %cst_14 = arith.constant 5.000000e-01 : f32
    %18 = vector.broadcast %cst_14 : f32 to vector<32x16xf32>
    %19 = arith.mulf %17, %18 : vector<32x16xf32>
    %20 = arith.addf %10, %13 : vector<32x16xf32>
    %21 = arith.subf %16, %19 : vector<32x16xf32>
    %22 = arith.subf %10, %13 : vector<32x16xf32>
    %23 = arith.addf %16, %19 : vector<32x16xf32>
    %c0_15 = arith.constant 0 : index
    %c0_16 = arith.constant 0 : index
    %c0_17 = arith.constant 0 : index
    %c0_18 = arith.constant 0 : index
    %c0_19 = arith.constant 0 : index
    %24 = vector.load %arg3[%c0_15, %c0_16, %c0_17, %c0_18, %c0_19] : memref<1x32x2x2x16xf32, #tpu.memory_space<vmem>>, vector<1x32x1x1x16xf32>
    %25 = vector.shape_cast %24 : vector<1x32x1x1x16xf32> to vector<32x16xf32>
    %26 = vector.shape_cast %20 : vector<32x16xf32> to vector<1x32x1x1x16xf32>
    tpu.vector_store %arg3[%c0_15, %c0_16, %c0_17, %c0_18, %c0_19], %26 {strides = array<i32>} : memref<1x32x2x2x16xf32, #tpu.memory_space<vmem>>, vector<1x32x1x1x16xf32>,
    %c0_20 = arith.constant 0 : index
    %c0_21 = arith.constant 0 : index
    %c0_22 = arith.constant 0 : index
    %c1_23 = arith.constant 1 : index
    %c0_24 = arith.constant 0 : index
    %27 = vector.load %arg3[%c0_20, %c0_21, %c0_22, %c1_23, %c0_24] : memref<1x32x2x2x16xf32, #tpu.memory_space<vmem>>, vector<1x32x1x1x16xf32>
    %28 = vector.shape_cast %27 : vector<1x32x1x1x16xf32> to vector<32x16xf32>
    %29 = vector.shape_cast %21 : vector<32x16xf32> to vector<1x32x1x1x16xf32>
    tpu.vector_store %arg3[%c0_20, %c0_21, %c0_22, %c1_23, %c0_24], %29 {strides = array<i32>} : memref<1x32x2x2x16xf32, #tpu.memory_space<vmem>>, vector<1x32x1x1x16xf32>,
    %c0_25 = arith.constant 0 : index
    %c0_26 = arith.constant 0 : index
    %c1_27 = arith.constant 1 : index
    %c0_28 = arith.constant 0 : index
    %c0_29 = arith.constant 0 : index
    %30 = vector.load %arg3[%c0_25, %c0_26, %c1_27, %c0_28, %c0_29] : memref<1x32x2x2x16xf32, #tpu.memory_space<vmem>>, vector<1x32x1x1x16xf32>
    %31 = vector.shape_cast %30 : vector<1x32x1x1x16xf32> to vector<32x16xf32>
    %32 = vector.shape_cast %22 : vector<32x16xf32> to vector<1x32x1x1x16xf32>
    tpu.vector_store %arg3[%c0_25, %c0_26, %c1_27, %c0_28, %c0_29], %32 {strides = array<i32>} : memref<1x32x2x2x16xf32, #tpu.memory_space<vmem>>, vector<1x32x1x1x16xf32>,
    %c0_30 = arith.constant 0 : index
    %c0_31 = arith.constant 0 : index
    %c1_32 = arith.constant 1 : index
    %c1_33 = arith.constant 1 : index
    %c0_34 = arith.constant 0 : index
    %33 = vector.load %arg3[%c0_30, %c0_31, %c1_32, %c1_33, %c0_34] : memref<1x32x2x2x16xf32, #tpu.memory_space<vmem>>, vector<1x32x1x1x16xf32>
    %34 = vector.shape_cast %33 : vector<1x32x1x1x16xf32> to vector<32x16xf32>
    %35 = vector.shape_cast %23 : vector<32x16xf32> to vector<1x32x1x1x16xf32>
    tpu.vector_store %arg3[%c0_30, %c0_31, %c1_32, %c1_33, %c0_34], %35 {strides = array<i32>} : memref<1x32x2x2x16xf32, #tpu.memory_space<vmem>>, vector<1x32x1x1x16xf32>,
    return
  }
  func.func @transform_0(%arg0: i32, %arg1: i32) -> (i32, i32, i32, i32) {
    %c0_i32 = arith.constant 0 : i32
    %c0_i32_0 = arith.constant 0 : i32
    %c0_i32_1 = arith.constant 0 : i32
    return %arg0, %c0_i32, %arg1, %c0_i32_0 : i32, i32, i32, i32
  }
  func.func @transform_1(%arg0: i32, %arg1: i32) -> (i32, i32, i32, i32, i32) {
    %c0_i32 = arith.constant 0 : i32
    %c0_i32_0 = arith.constant 0 : i32
    %c0_i32_1 = arith.constant 0 : i32
    %c0_i32_2 = arith.constant 0 : i32
    return %arg0, %arg1, %c0_i32, %c0_i32_0, %c0_i32_1 : i32, i32, i32, i32, i32
  }
}

</mosaic_0001>

<bundles_post_ra>
// kernel: _iwt_pallas.1
= control target key start
LH: loop header
LB: loop body
LE: loop exit
PB: predicated region body
PF: predicated region fallthrough
CT: control target
= control target key end

     0   :  { %6 = vsyncpa [#allocation3], 0  ;;  %s1521_s0 = inlined_call_operand.hbm [shape: f32[2,4,32,16], index: 0, kind: input, shape index: {}]   ;;  %s1522_s1 = inlined_call_operand.vmem [shape: f32[2,32,2,2,16], index: 1, kind: output, shape index: {}]  }
   0x1   :  { %8 = vsyncpa [#allocation3 + $0x1], 0  ;;  %s949_s6 = smov 0   ;;  %s951_s7 = smov 0  }
   0x2   :  { %s953_s8 = smov 0   ;;  %s955_s9 = smov 0  }
   0x3   :  { %s957_s10 = smov 0   ;;  %s959_s11 = smov 0  }
   0x4 LB: > { %s707_s12 = sadd.s32 4294967295, %s935_s11   ;;  %s26_s13 = sadd.s32 1, %s931_s10  ;;  %s935_s11 = sphi %s959_s11, %s14_s11   ;;  %s931_s10 = sphi %s957_s10, %s1529_s10   ;;  %s927_s9 = sphi %s955_s9, %s1528_s9   ;;  %s923_s8 = sphi %s953_s8, %s1527_s8   ;;  %s919_s7 = sphi %s951_s7, %s1526_s7   ;;  %s915_s6 = sphi %s949_s6, %s1525_s6  }
   0x5   : > { %p28_p0 = scmp.ge.s32.totalorder %s26_s13, 2  ;;  %s35_s14 = sadd.s32 1, %s923_s8 }
   0x6   : > { %p42_p1 = scmp.ne.s32.totalorder %s923_s8, %s919_s7  ;;  %p43_p2 = scmp.eq.s32.totalorder %s935_s11, 0 }
   0x7   : > { %s1531_s13 = smov (%p28_p0, %s26_s13), 0  ;;  %p48_p4 = scmp.ne.s32.totalorder %s919_s7, %s915_s6 }
   0x8   : > { %p985_p3 = por %p43_p2, %p42_p1  ;;  %s30_s16 = ssub.s32 %s931_s10, %s1531_s13 }
   0x9   : > { %p49_p5 = scmp.eq.s32.totalorder %s707_s12, 0  ;;  %p33_p6 = scmp.eq.s32.totalorder %s30_s16, 0 }
   0xa   : > { %p804_p8 = scmp.lt.s32.totalorder %s935_s11, 2  ;;  %s100_s19 = sand.u32 1, %s923_s8  }
   0xb   : > { %p992_p7 = por %p49_p5, %p48_p4  ;;  %s796_s20 = sshll.u32 %s931_s10, 7 }
   0xc   : > { %s998_s18 = scalar_select %p33_p6, %s923_s8, %s35_s14  }
   0xd   : > { %s711_s21 = sshll.u32 %s100_s19, 7  ;;  %s111_s24 = scalar_lea.hbm %s1521_s0, %s796_s20 }
   0xe   : > { %s112_s25 = sshll.u32 %s111_s24, 4  ;;  %s104_s26 = scalar_lea.vmem [#allocation2], %s711_s21  ;;  %s113_s25 = int_to_ptr.hbm [resolvable:$true] %s112_s25 }
   0xf   : > { %s114_s27 = sshll.u32 %s104_s26, 4  ;;  %p801_p9 = pnand %p804_p8, %p985_p3  ;;  %s115_s27 = int_to_ptr.vmem [resolvable:$true] %s114_s27 }
  0x10   : > { %p714_p10 = scmp.ge.s32.totalorder %s935_s11, 1  ;;  %p122_p11 = scmp.lt.s32.totalorder %s935_s11, 3 }
  0x11   : > { %s101_s28 = scalar_lea.sflag [#allocation3], %s100_s19  ;;  %s937_s29 = smov 128  }
  0x12   : > { %s938_s30 = smov 8   ;;  %p123_p12 = pnand %p714_p10, %p122_p11 }
  0x13   : > { %803 = dma.hbm_to_vmem [thread:$0]  (!%p801_p9), %s113_s25, 2048, %s115_s27, %s101_s28, %s937_s29, %s937_s29, %s938_s30  }
  0x14   : > { %126 = sbr.rel (%p123_p12) target bundleno = 164 (0xa4), region = 24  ;;  %s128_s2 = sand.u32 (!%p123_p12), 1, %s919_s7  }
  0x15   : > { %s715_s3 = sshll.u32 (!%p123_p12), %s128_s2, 7  ;;  %s129_s4 = scalar_lea.sflag (!%p123_p12), [#allocation3], %s128_s2 }
  0x16   : > { %s1010_s5 = scalar_lea.vmem (!%p123_p12), [#allocation2], %s715_s3 }
  0x19   : > { %910 = dma.done.wait (%p992_p7), %s129_s4, 2048  }
  0x1a   : > { %912 = vsyncadd (%p992_p7), %s129_s4, 4294965248  ;;  %p159_p13 = scmp.lt.s32.totalorder %s927_s9, 1  ;;  %v1019_v0 = vld [vmem:[%s1010_s5] sm:$0xff]  ;;  %v1033_v5 = vld [vmem:[%s1010_s5 + $0x8] sm:$0xff]  ;;  %vm296_vm0 = vcmask 122880  }
  0x1b   : > { %v1022_v1 = vld [vmem:[%s1010_s5 + $0x20] sm:$0xff]  ;;  %v1036_v6 = vld [vmem:[%s1010_s5 + $0x28] sm:$0xff]  ;;  %v1064_v16 = vld [vmem:[%s1010_s5 + $0x10] sm:$0xff] }
  0x1c   : > { %s1533_s9 = smov (!%p159_p13, %s927_s9), 1  ;;  %v1025_v2 = vld [vmem:[%s1010_s5 + $0x40] sm:$0xff]  ;;  %v188_v4 = vsub.f32 %v1019_v0, %v1022_v1  ;;  %v1041_v8 = vld [vmem:[%s1010_s5 + $0x48] sm:$0xff]  ;;  %v189_v10 = vsub.f32 %v1033_v5, %v1036_v6  ;;  %v1069_v18 = vld [vmem:[%s1010_s5 + $0x30] sm:$0xff]  ;;  %v204_v55 = vadd.f32 %v1022_v1, %v1019_v0 }
  0x1d   : > { %v1028_v3 = vld [vmem:[%s1010_s5 + $0x60] sm:$0xff]  ;;  %s797_s6 = sshll.u32 %s1533_s9, 7  ;;  %v1044_v9 = vld [vmem:[%s1010_s5 + $0x68] sm:$0xff]  ;;  %v1072_v19 = vld [vmem:[%s1010_s5 + $0x50] sm:$0xff]  ;;  %v190_v26 = vsub.f32 %v1064_v16, %v1069_v18 }
  0x1e   : > { %v196_v7 = vsub.f32 %v1028_v3, %v1025_v2  ;;  %v1048_v11 = vmul.f32 0.5, %v188_v4  ;;  %v197_v12 = vsub.f32 %v1044_v9, %v1041_v8  ;;  %v1054_v14 = vmul.f32 0.5, %v189_v10  ;;  %s1059_s14 = scalar_lea.vmem %s1522_s1, %s797_s6  ;;  %v1075_v20 = vld [vmem:[%s1010_s5 + $0x70] sm:$0xff]  ;;  %v1100_v34 = vld [vmem:[%s1010_s5 + $0x18] sm:$0xff] }
  0x1f   : > { %v198_v27 = vsub.f32 %v1075_v20, %v1072_v19  ;;  %v1095_v32 = vmul.f32 0.5, %v190_v26  ;;  %v1105_v36 = vld [vmem:[%s1010_s5 + $0x38] sm:$0xff]  ;;  %v212_v56 = vadd.f32 %v1028_v3, %v1025_v2  ;;  %v1159_v60 = vmul.f32 0.5, %v204_v55 }
  0x20   : > { %v1052_v13 = vmul.f32 0.5, %v196_v7  ;;  %v1061_v15 = vmul.f32 0.5, %v197_v12  ;;  %v1108_v37 = vld [vmem:[%s1010_s5 + $0x58] sm:$0xff]  ;;  %v191_v43 = vsub.f32 %v1100_v34, %v1105_v36  ;;  %v205_v3 = vadd.f32 %v1036_v6, %v1033_v5 }
  0x21   : > { %v1097_v33 = vmul.f32 0.5, %v198_v27  ;;  %v1111_v38 = vld [vmem:[%s1010_s5 + $0x78] sm:$0xff]  ;;  %v1161_v61 = vmul.f32 0.5, %v212_v56  ;;  %v213_v4 = vadd.f32 %v1044_v9, %v1041_v8 }
  0x22   : > { %v220_v17 = vadd.f32 %v1052_v13, %v1048_v11  ;;  %v221_v21 = vadd.f32 %v1061_v15, %v1054_v14  ;;  %v199_v44 = vsub.f32 %v1111_v38, %v1108_v37  ;;  %v1133_v48 = vmul.f32 0.5, %v191_v43 }
  0x23   : > { %v222_v42 = vadd.f32 %v1097_v33, %v1095_v32  ;;  %v224_v2 = vsub.f32 %v1159_v60, %v1161_v61  ;;  %v1183_v12 = vsub.f32 %v1048_v11, %v1052_v13  ;;  %v1189_v6 = vmul.f32 0.5, %v205_v3 }
  0x24   : > { %297 = vst.msk [vmem:[%s1059_s14] sm:$0x1] %vm296_vm0, %v220_v17  ;;  %v240_v22 = vrot.slane %v220_v17, 1  ;;  %v241_v23 = vrot.slane %v220_v17, 2  ;;  %v242_v24 = vrot.slane %v220_v17, 3  ;;  %v243_v25 = vrot.slane %v220_v17, 4 }
  0x25   : > { %305 = vst.msk [vmem:[%s1059_s14 + $0x20] sm:$0x1] %vm296_vm0, %v221_v21  ;;  %v244_v28 = vrot.slane %v220_v17, 5  ;;  %v245_v29 = vrot.slane %v220_v17, 6  ;;  %v246_v30 = vrot.slane %v220_v17, 7  ;;  %v247_v31 = vrot.slane %v221_v21, 1 }
  0x26   : > { %298 = vst.msk [vmem:[%s1059_s14 + $0x4] sm:$0x1] %vm296_vm0, %v240_v22  ;;  %v248_v35 = vrot.slane %v221_v21, 2  ;;  %v249_v39 = vrot.slane %v221_v21, 3  ;;  %v250_v40 = vrot.slane %v221_v21, 4  ;;  %v251_v41 = vrot.slane %v221_v21, 5 }
  0x27   : > { %299 = vst.msk [vmem:[%s1059_s14 + $0x8] sm:$0x1] %vm296_vm0, %v241_v23  ;;  %v252_v45 = vrot.slane %v221_v21, 6  ;;  %v253_v46 = vrot.slane %v221_v21, 7  ;;  %v254_v47 = vrot.slane %v222_v42, 1  ;;  %v1135_v49 = vmul.f32 0.5, %v199_v44 }
  0x28   : > { %300 = vst.msk [vmem:[%s1059_s14 + $0xc] sm:$0x1] %vm296_vm0, %v242_v24  ;;  %v255_v50 = vrot.slane %v222_v42, 2  ;;  %v256_v51 = vrot.slane %v222_v42, 3  ;;  %v257_v52 = vrot.slane %v222_v42, 4  ;;  %v258_v53 = vrot.slane %v222_v42, 5 }
  0x29   : > { %301 = vst.msk [vmem:[%s1059_s14 + $0x10] sm:$0x1] %vm296_vm0, %v243_v25  ;;  %v223_v54 = vadd.f32 %v1135_v49, %v1133_v48  ;;  %v259_v57 = vrot.slane %v222_v42, 6  ;;  %v260_v58 = vrot.slane %v222_v42, 7  ;;  %v333_v5 = vrot.slane %v224_v2, 1 }
  0x2a   : > { %302 = vst.msk [vmem:[%s1059_s14 + $0x14] sm:$0x1] %vm296_vm0, %v244_v28  ;;  %v1191_v8 = vmul.f32 0.5, %v213_v4  ;;  %v334_v9 = vrot.slane %v224_v2, 2  ;;  %v335_v11 = vrot.slane %v224_v2, 3  ;;  %v336_v13 = vrot.slane %v224_v2, 4 }
  0x2b   : > { %303 = vst.msk [vmem:[%s1059_s14 + $0x18] sm:$0x1] %vm296_vm0, %v245_v29  ;;  %v261_v59 = vrot.slane %v223_v54, 1  ;;  %v262_v62 = vrot.slane %v223_v54, 2  ;;  %v263_v63 = vrot.slane %v223_v54, 3  ;;  %v264_v0 = vrot.slane %v223_v54, 4 }
  0x2c   : > { %304 = vst.msk [vmem:[%s1059_s14 + $0x1c] sm:$0x1] %vm296_vm0, %v246_v30  ;;  %v265_v1 = vrot.slane %v223_v54, 5  ;;  %v266_v7 = vrot.slane %v223_v54, 6  ;;  %v267_v10 = vrot.slane %v223_v54, 7  ;;  %v337_v17 = vrot.slane %v224_v2, 5 }
  0x2d   : > { %306 = vst.msk [vmem:[%s1059_s14 + $0x24] sm:$0x1] %vm296_vm0, %v247_v31  ;;  %v225_v21 = vsub.f32 %v1189_v6, %v1191_v8  ;;  %v206_v22 = vadd.f32 %v1069_v18, %v1064_v16  ;;  %v214_v23 = vadd.f32 %v1075_v20, %v1072_v19  ;;  %v338_v24 = vrot.slane %v224_v2, 6 }
  0x2e   : > { %307 = vst.msk [vmem:[%s1059_s14 + $0x28] sm:$0x1] %vm296_vm0, %v248_v35  ;;  %v339_v25 = vrot.slane %v224_v2, 7  ;;  %v1213_v26 = vsub.f32 %v1054_v14, %v1061_v15  ;;  %v207_v29 = vadd.f32 %v1105_v36, %v1100_v34  ;;  %v215_v30 = vadd.f32 %v1111_v38, %v1108_v37 }
  0x2f   : > { %308 = vst.msk [vmem:[%s1059_s14 + $0x2c] sm:$0x1] %vm296_vm0, %v249_v39  ;;  %v340_v16 = vrot.slane %v225_v21, 1  ;;  %v1219_v18 = vmul.f32 0.5, %v206_v22  ;;  %v1221_v19 = vmul.f32 0.5, %v214_v23  ;;  %v341_v20 = vrot.slane %v225_v21, 2 }
  0x30   : > { %309 = vst.msk [vmem:[%s1059_s14 + $0x30] sm:$0x1] %vm296_vm0, %v250_v40  ;;  %v342_v14 = vrot.slane %v225_v21, 3  ;;  %v343_v15 = vrot.slane %v225_v21, 4  ;;  %v344_v27 = vrot.slane %v225_v21, 5  ;;  %v345_v31 = vrot.slane %v225_v21, 6 }
  0x31   : > { %310 = vst.msk [vmem:[%s1059_s14 + $0x34] sm:$0x1] %vm296_vm0, %v251_v41  ;;  %v226_v28 = vsub.f32 %v1219_v18, %v1221_v19  ;;  %v346_v35 = vrot.slane %v225_v21, 7  ;;  %v1243_v39 = vsub.f32 %v1095_v32, %v1097_v33  ;;  %v1249_v36 = vmul.f32 0.5, %v207_v29 }
  0x32   : > { %311 = vst.msk [vmem:[%s1059_s14 + $0x38] sm:$0x1] %vm296_vm0, %v252_v45  ;;  %v1251_v37 = vmul.f32 0.5, %v215_v30  ;;  %v1269_v44 = vsub.f32 %v1133_v48, %v1135_v49  ;;  %v427_v55 = vrot.slane %v1183_v12, 3  ;;  %v428_v56 = vrot.slane %v1183_v12, 4 }
  0x33   : > { %312 = vst.msk [vmem:[%s1059_s14 + $0x3c] sm:$0x1] %vm296_vm0, %v253_v46  ;;  %v347_v34 = vrot.slane %v226_v28, 1  ;;  %v348_v38 = vrot.slane %v226_v28, 2  ;;  %v349_v32 = vrot.slane %v226_v28, 3  ;;  %v350_v33 = vrot.slane %v226_v28, 4 }
  0x34   : > { %313 = vst.msk [vmem:[%s1059_s14 + $0x40] sm:$0x1] %vm296_vm0, %v222_v42  ;;  %v351_v40 = vrot.slane %v226_v28, 5  ;;  %v227_v41 = vsub.f32 %v1249_v36, %v1251_v37  ;;  %v352_v42 = vrot.slane %v226_v28, 6  ;;  %v353_v43 = vrot.slane %v226_v28, 7 }
  0x35   : > { %314 = vst.msk [vmem:[%s1059_s14 + $0x44] sm:$0x1] %vm296_vm0, %v254_v47  ;;  %v438_v3 = vrot.slane %v1213_v26, 7  ;;  %v1345_v4 = vadd.f32 %v1221_v19, %v1219_v18  ;;  %v449_v22 = vrot.slane %v1269_v44, 4  ;;  %v450_v23 = vrot.slane %v1269_v44, 5 }
  0x36   : > { %315 = vst.msk [vmem:[%s1059_s14 + $0x48] sm:$0x1] %vm296_vm0, %v255_v50  ;;  %v354_v45 = vrot.slane %v227_v41, 1  ;;  %v355_v46 = vrot.slane %v227_v41, 2  ;;  %v356_v47 = vrot.slane %v227_v41, 3  ;;  %v357_v48 = vrot.slane %v227_v41, 4 }
  0x37   : > { %316 = vst.msk [vmem:[%s1059_s14 + $0x4c] sm:$0x1] %vm296_vm0, %v256_v51  ;;  %v358_v49 = vrot.slane %v227_v41, 5  ;;  %v359_v50 = vrot.slane %v227_v41, 6  ;;  %v360_v51 = vrot.slane %v227_v41, 7 }
  0x38   : > { %317 = vst.msk [vmem:[%s1059_s14 + $0x50] sm:$0x1] %vm296_vm0, %v257_v52  ;;  %v1289_v52 = vadd.f32 %v1161_v61, %v1159_v60  ;;  %v1317_v60 = vadd.f32 %v1191_v8, %v1189_v6  ;;  %v432_v61 = vrot.slane %v1213_v26, 1  ;;  %v443_v6 = vrot.slane %v1243_v39, 5 }
  0x39   : > { %318 = vst.msk [vmem:[%s1059_s14 + $0x54] sm:$0x1] %vm296_vm0, %v258_v53  ;;  %v425_v53 = vrot.slane %v1183_v12, 1  ;;  %v444_v8 = vrot.slane %v1243_v39, 6 }
  0x3a   : > { %319 = vst.msk [vmem:[%s1059_s14 + $0x58] sm:$0x1] %vm296_vm0, %v259_v57  ;;  %v429_v57 = vrot.slane %v1183_v12, 5  ;;  %v520_v18 = vrot.slane %v1289_v52, 3  ;;  %v521_v19 = vrot.slane %v1289_v52, 4  ;;  %v527_v29 = vrot.slane %v1317_v60, 3 }
  0x3b   : > { %320 = vst.msk [vmem:[%s1059_s14 + $0x5c] sm:$0x1] %vm296_vm0, %v260_v58  ;;  %v430_v58 = vrot.slane %v1183_v12, 6  ;;  %v528_v30 = vrot.slane %v1317_v60, 4 }
  0x3c   : > { %321 = vst.msk [vmem:[%s1059_s14 + $0x60] sm:$0x1] %vm296_vm0, %v223_v54  ;;  %v426_v54 = vrot.slane %v1183_v12, 2 }
  0x3d   : > { %322 = vst.msk [vmem:[%s1059_s14 + $0x64] sm:$0x1] %vm296_vm0, %v261_v59  ;;  %v431_v59 = vrot.slane %v1183_v12, 7 }
  0x3e   : > { %323 = vst.msk [vmem:[%s1059_s14 + $0x68] sm:$0x1] %vm296_vm0, %v262_v62  ;;  %v433_v62 = vrot.slane %v1213_v26, 2 }
  0x3f   : > { %324 = vst.msk [vmem:[%s1059_s14 + $0x6c] sm:$0x1] %vm296_vm0, %v263_v63  ;;  %v434_v63 = vrot.slane %v1213_v26, 3 }
  0x40   : > { %325 = vst.msk [vmem:[%s1059_s14 + $0x70] sm:$0x1] %vm296_vm0, %v264_v0  ;;  %v435_v0 = vrot.slane %v1213_v26, 4 }
  0x41   : > { %326 = vst.msk [vmem:[%s1059_s14 + $0x74] sm:$0x1] %vm296_vm0, %v265_v1  ;;  %v436_v1 = vrot.slane %v1213_v26, 5 }
  0x42   : > { %327 = vst.msk [vmem:[%s1059_s14 + $0x78] sm:$0x1] %vm296_vm0, %v266_v7  ;;  %v439_v7 = vrot.slane %v1243_v39, 1 }
  0x43   : > { %328 = vst.msk [vmem:[%s1059_s14 + $0x7c] sm:$0x1] %vm296_vm0, %v267_v10  ;;  %v440_v10 = vrot.slane %v1243_v39, 2 }
  0x44   : > { %389 = vst.msk [vmem:[%s1059_s14 + $0x1] sm:$0x1] %vm296_vm0, %v224_v2  ;;  %v437_v2 = vrot.slane %v1213_v26, 6 }
  0x45   : > { %390 = vst.msk [vmem:[%s1059_s14 + $0x5] sm:$0x1] %vm296_vm0, %v333_v5  ;;  %v442_v5 = vrot.slane %v1243_v39, 4 }
  0x46   : > { %391 = vst.msk [vmem:[%s1059_s14 + $0x9] sm:$0x1] %vm296_vm0, %v334_v9  ;;  %v445_v9 = vrot.slane %v1243_v39, 7 }
  0x47   : > { %392 = vst.msk [vmem:[%s1059_s14 + $0xd] sm:$0x1] %vm296_vm0, %v335_v11  ;;  %v1373_v11 = vadd.f32 %v1251_v37, %v1249_v36  ;;  %v533_v36 = vrot.slane %v1345_v4, 2  ;;  %v534_v37 = vrot.slane %v1345_v4, 3 }
  0x48   : > { %393 = vst.msk [vmem:[%s1059_s14 + $0x11] sm:$0x1] %vm296_vm0, %v336_v13  ;;  %v446_v13 = vrot.slane %v1269_v44, 1 }
  0x49   : > { %394 = vst.msk [vmem:[%s1059_s14 + $0x15] sm:$0x1] %vm296_vm0, %v337_v17  ;;  %v447_v17 = vrot.slane %v1269_v44, 2 }
  0x4a   : > { %395 = vst.msk [vmem:[%s1059_s14 + $0x19] sm:$0x1] %vm296_vm0, %v338_v24  ;;  %v451_v24 = vrot.slane %v1269_v44, 6 }
  0x4b   : > { %396 = vst.msk [vmem:[%s1059_s14 + $0x1d] sm:$0x1] %vm296_vm0, %v339_v25  ;;  %v452_v25 = vrot.slane %v1269_v44, 7 }
  0x4c   : > { %397 = vst.msk [vmem:[%s1059_s14 + $0x21] sm:$0x1] %vm296_vm0, %v225_v21  ;;  %v448_v21 = vrot.slane %v1269_v44, 3 }
  0x4d   : > { %398 = vst.msk [vmem:[%s1059_s14 + $0x25] sm:$0x1] %vm296_vm0, %v340_v16  ;;  %v519_v16 = vrot.slane %v1289_v52, 2 }
  0x4e   : > { %399 = vst.msk [vmem:[%s1059_s14 + $0x29] sm:$0x1] %vm296_vm0, %v341_v20  ;;  %v522_v20 = vrot.slane %v1289_v52, 5 }
  0x4f   : > { %400 = vst.msk [vmem:[%s1059_s14 + $0x2d] sm:$0x1] %vm296_vm0, %v342_v14  ;;  %v523_v14 = vrot.slane %v1289_v52, 6 }
  0x50   : > { %401 = vst.msk [vmem:[%s1059_s14 + $0x31] sm:$0x1] %vm296_vm0, %v343_v15  ;;  %v524_v15 = vrot.slane %v1289_v52, 7 }
  0x51   : > { %402 = vst.msk [vmem:[%s1059_s14 + $0x35] sm:$0x1] %vm296_vm0, %v344_v27  ;;  %v525_v27 = vrot.slane %v1317_v60, 1 }
  0x52   : > { %403 = vst.msk [vmem:[%s1059_s14 + $0x39] sm:$0x1] %vm296_vm0, %v345_v31  ;;  %v529_v31 = vrot.slane %v1317_v60, 5 }
  0x53   : > { %404 = vst.msk [vmem:[%s1059_s14 + $0x3d] sm:$0x1] %vm296_vm0, %v346_v35  ;;  %v530_v35 = vrot.slane %v1317_v60, 6 }
  0x54   : > { %405 = vst.msk [vmem:[%s1059_s14 + $0x41] sm:$0x1] %vm296_vm0, %v226_v28  ;;  %v526_v28 = vrot.slane %v1317_v60, 2 }
  0x55   : > { %406 = vst.msk [vmem:[%s1059_s14 + $0x45] sm:$0x1] %vm296_vm0, %v347_v34  ;;  %v532_v34 = vrot.slane %v1345_v4, 1 }
  0x56   : > { %407 = vst.msk [vmem:[%s1059_s14 + $0x49] sm:$0x1] %vm296_vm0, %v348_v38  ;;  %v535_v38 = vrot.slane %v1345_v4, 4 }
  0x57   : > { %408 = vst.msk [vmem:[%s1059_s14 + $0x4d] sm:$0x1] %vm296_vm0, %v349_v32  ;;  %v536_v32 = vrot.slane %v1345_v4, 5 }
  0x58   : > { %409 = vst.msk [vmem:[%s1059_s14 + $0x51] sm:$0x1] %vm296_vm0, %v350_v33  ;;  %v537_v33 = vrot.slane %v1345_v4, 6 }
  0x59   : > { %410 = vst.msk [vmem:[%s1059_s14 + $0x55] sm:$0x1] %vm296_vm0, %v351_v40  ;;  %v538_v40 = vrot.slane %v1345_v4, 7 }
  0x5a   : > { %411 = vst.msk [vmem:[%s1059_s14 + $0x59] sm:$0x1] %vm296_vm0, %v352_v42  ;;  %v540_v42 = vrot.slane %v1373_v11, 2 }
  0x5b   : > { %412 = vst.msk [vmem:[%s1059_s14 + $0x5d] sm:$0x1] %vm296_vm0, %v353_v43  ;;  %v541_v43 = vrot.slane %v1373_v11, 3 }
  0x5c   : > { %413 = vst.msk [vmem:[%s1059_s14 + $0x61] sm:$0x1] %vm296_vm0, %v227_v41  ;;  %v539_v41 = vrot.slane %v1373_v11, 1 }
  0x5d   : > { %414 = vst.msk [vmem:[%s1059_s14 + $0x65] sm:$0x1] %vm296_vm0, %v354_v45  ;;  %v543_v45 = vrot.slane %v1373_v11, 5 }
  0x5e   : > { %415 = vst.msk [vmem:[%s1059_s14 + $0x69] sm:$0x1] %vm296_vm0, %v355_v46  ;;  %v544_v46 = vrot.slane %v1373_v11, 6 }
  0x5f   : > { %416 = vst.msk [vmem:[%s1059_s14 + $0x6d] sm:$0x1] %vm296_vm0, %v356_v47  ;;  %v545_v47 = vrot.slane %v1373_v11, 7 }
  0x60   : > { %417 = vst.msk [vmem:[%s1059_s14 + $0x71] sm:$0x1] %vm296_vm0, %v357_v48 }
  0x61   : > { %418 = vst.msk [vmem:[%s1059_s14 + $0x75] sm:$0x1] %vm296_vm0, %v358_v49 }
  0x62   : > { %419 = vst.msk [vmem:[%s1059_s14 + $0x79] sm:$0x1] %vm296_vm0, %v359_v50 }
  0x63   : > { %420 = vst.msk [vmem:[%s1059_s14 + $0x7d] sm:$0x1] %vm296_vm0, %v360_v51 }
  0x64   : > { %730 = vst.msk [vmem:[%s1059_s14 + $0x2] sm:$0x1] %vm296_vm0, %v1183_v12  ;;  %v441_v12 = vrot.slane %v1243_v39, 3 }
  0x65   : > { %731 = vst.msk [vmem:[%s1059_s14 + $0x6] sm:$0x1] %vm296_vm0, %v425_v53 }
  0x66   : > { %732 = vst.msk [vmem:[%s1059_s14 + $0xa] sm:$0x1] %vm296_vm0, %v426_v54 }
  0x67   : > { %733 = vst.msk [vmem:[%s1059_s14 + $0xe] sm:$0x1] %vm296_vm0, %v427_v55 }
  0x68   : > { %734 = vst.msk [vmem:[%s1059_s14 + $0x12] sm:$0x1] %vm296_vm0, %v428_v56 }
  0x69   : > { %735 = vst.msk [vmem:[%s1059_s14 + $0x16] sm:$0x1] %vm296_vm0, %v429_v57 }
  0x6a   : > { %736 = vst.msk [vmem:[%s1059_s14 + $0x1a] sm:$0x1] %vm296_vm0, %v430_v58 }
  0x6b   : > { %737 = vst.msk [vmem:[%s1059_s14 + $0x1e] sm:$0x1] %vm296_vm0, %v431_v59 }
  0x6c   : > { %738 = vst.msk [vmem:[%s1059_s14 + $0x22] sm:$0x1] %vm296_vm0, %v1213_v26  ;;  %v518_v26 = vrot.slane %v1289_v52, 1 }
  0x6d   : > { %739 = vst.msk [vmem:[%s1059_s14 + $0x26] sm:$0x1] %vm296_vm0, %v432_v61 }
  0x6e   : > { %740 = vst.msk [vmem:[%s1059_s14 + $0x2a] sm:$0x1] %vm296_vm0, %v433_v62 }
  0x6f   : > { %741 = vst.msk [vmem:[%s1059_s14 + $0x2e] sm:$0x1] %vm296_vm0, %v434_v63 }
  0x70   : > { %742 = vst.msk [vmem:[%s1059_s14 + $0x32] sm:$0x1] %vm296_vm0, %v435_v0 }
  0x71   : > { %743 = vst.msk [vmem:[%s1059_s14 + $0x36] sm:$0x1] %vm296_vm0, %v436_v1 }
  0x72   : > { %744 = vst.msk [vmem:[%s1059_s14 + $0x3a] sm:$0x1] %vm296_vm0, %v437_v2 }
  0x73   : > { %745 = vst.msk [vmem:[%s1059_s14 + $0x3e] sm:$0x1] %vm296_vm0, %v438_v3 }
  0x74   : > { %746 = vst.msk [vmem:[%s1059_s14 + $0x42] sm:$0x1] %vm296_vm0, %v1243_v39  ;;  %v531_v39 = vrot.slane %v1317_v60, 7 }
  0x75   : > { %747 = vst.msk [vmem:[%s1059_s14 + $0x46] sm:$0x1] %vm296_vm0, %v439_v7 }
  0x76   : > { %748 = vst.msk [vmem:[%s1059_s14 + $0x4a] sm:$0x1] %vm296_vm0, %v440_v10 }
  0x77   : > { %749 = vst.msk [vmem:[%s1059_s14 + $0x4e] sm:$0x1] %vm296_vm0, %v441_v12 }
  0x78   : > { %750 = vst.msk [vmem:[%s1059_s14 + $0x52] sm:$0x1] %vm296_vm0, %v442_v5 }
  0x79   : > { %751 = vst.msk [vmem:[%s1059_s14 + $0x56] sm:$0x1] %vm296_vm0, %v443_v6 }
  0x7a   : > { %752 = vst.msk [vmem:[%s1059_s14 + $0x5a] sm:$0x1] %vm296_vm0, %v444_v8 }
  0x7b   : > { %753 = vst.msk [vmem:[%s1059_s14 + $0x5e] sm:$0x1] %vm296_vm0, %v445_v9 }
  0x7c   : > { %754 = vst.msk [vmem:[%s1059_s14 + $0x62] sm:$0x1] %vm296_vm0, %v1269_v44  ;;  %v542_v44 = vrot.slane %v1373_v11, 4 }
  0x7d   : > { %755 = vst.msk [vmem:[%s1059_s14 + $0x66] sm:$0x1] %vm296_vm0, %v446_v13 }
  0x7e   : > { %756 = vst.msk [vmem:[%s1059_s14 + $0x6a] sm:$0x1] %vm296_vm0, %v447_v17 }
  0x7f   : > { %757 = vst.msk [vmem:[%s1059_s14 + $0x6e] sm:$0x1] %vm296_vm0, %v448_v21 }
  0x80   : > { %758 = vst.msk [vmem:[%s1059_s14 + $0x72] sm:$0x1] %vm296_vm0, %v449_v22 }
  0x81   : > { %759 = vst.msk [vmem:[%s1059_s14 + $0x76] sm:$0x1] %vm296_vm0, %v450_v23 }
  0x82   : > { %760 = vst.msk [vmem:[%s1059_s14 + $0x7a] sm:$0x1] %vm296_vm0, %v451_v24 }
  0x83   : > { %761 = vst.msk [vmem:[%s1059_s14 + $0x7e] sm:$0x1] %vm296_vm0, %v452_v25 }
  0x84   : > { %762 = vst.msk [vmem:[%s1059_s14 + $0x3] sm:$0x1] %vm296_vm0, %v1289_v52 }
  0x85   : > { %763 = vst.msk [vmem:[%s1059_s14 + $0x7] sm:$0x1] %vm296_vm0, %v518_v26 }
  0x86   : > { %764 = vst.msk [vmem:[%s1059_s14 + $0xb] sm:$0x1] %vm296_vm0, %v519_v16 }
  0x87   : > { %765 = vst.msk [vmem:[%s1059_s14 + $0xf] sm:$0x1] %vm296_vm0, %v520_v18 }
  0x88   : > { %766 = vst.msk [vmem:[%s1059_s14 + $0x13] sm:$0x1] %vm296_vm0, %v521_v19 }
  0x89   : > { %767 = vst.msk [vmem:[%s1059_s14 + $0x17] sm:$0x1] %vm296_vm0, %v522_v20 }
  0x8a   : > { %768 = vst.msk [vmem:[%s1059_s14 + $0x1b] sm:$0x1] %vm296_vm0, %v523_v14 }
  0x8b   : > { %769 = vst.msk [vmem:[%s1059_s14 + $0x1f] sm:$0x1] %vm296_vm0, %v524_v15 }
  0x8c   : > { %770 = vst.msk [vmem:[%s1059_s14 + $0x23] sm:$0x1] %vm296_vm0, %v1317_v60 }
  0x8d   : > { %771 = vst.msk [vmem:[%s1059_s14 + $0x27] sm:$0x1] %vm296_vm0, %v525_v27 }
  0x8e   : > { %772 = vst.msk [vmem:[%s1059_s14 + $0x2b] sm:$0x1] %vm296_vm0, %v526_v28 }
  0x8f   : > { %773 = vst.msk [vmem:[%s1059_s14 + $0x2f] sm:$0x1] %vm296_vm0, %v527_v29 }
  0x90   : > { %774 = vst.msk [vmem:[%s1059_s14 + $0x33] sm:$0x1] %vm296_vm0, %v528_v30 }
  0x91   : > { %775 = vst.msk [vmem:[%s1059_s14 + $0x37] sm:$0x1] %vm296_vm0, %v529_v31 }
  0x92   : > { %776 = vst.msk [vmem:[%s1059_s14 + $0x3b] sm:$0x1] %vm296_vm0, %v530_v35 }
  0x93   : > { %777 = vst.msk [vmem:[%s1059_s14 + $0x3f] sm:$0x1] %vm296_vm0, %v531_v39 }
  0x94   : > { %778 = vst.msk [vmem:[%s1059_s14 + $0x43] sm:$0x1] %vm296_vm0, %v1345_v4 }
  0x95   : > { %779 = vst.msk [vmem:[%s1059_s14 + $0x47] sm:$0x1] %vm296_vm0, %v532_v34 }
  0x96   : > { %780 = vst.msk [vmem:[%s1059_s14 + $0x4b] sm:$0x1] %vm296_vm0, %v533_v36 }
  0x97   : > { %781 = vst.msk [vmem:[%s1059_s14 + $0x4f] sm:$0x1] %vm296_vm0, %v534_v37 }
  0x98   : > { %782 = vst.msk [vmem:[%s1059_s14 + $0x53] sm:$0x1] %vm296_vm0, %v535_v38 }
  0x99   : > { %783 = vst.msk [vmem:[%s1059_s14 + $0x57] sm:$0x1] %vm296_vm0, %v536_v32 }
  0x9a   : > { %784 = vst.msk [vmem:[%s1059_s14 + $0x5b] sm:$0x1] %vm296_vm0, %v537_v33 }
  0x9b   : > { %785 = vst.msk [vmem:[%s1059_s14 + $0x5f] sm:$0x1] %vm296_vm0, %v538_v40 }
  0x9c   : > { %786 = vst.msk [vmem:[%s1059_s14 + $0x63] sm:$0x1] %vm296_vm0, %v1373_v11 }
  0x9d   : > { %787 = vst.msk [vmem:[%s1059_s14 + $0x67] sm:$0x1] %vm296_vm0, %v539_v41 }
  0x9e   : > { %788 = vst.msk [vmem:[%s1059_s14 + $0x6b] sm:$0x1] %vm296_vm0, %v540_v42 }
  0x9f   : > { %789 = vst.msk [vmem:[%s1059_s14 + $0x6f] sm:$0x1] %vm296_vm0, %v541_v43 }
  0xa0   : > { %790 = vst.msk [vmem:[%s1059_s14 + $0x73] sm:$0x1] %vm296_vm0, %v542_v44 }
  0xa1   : > { %791 = vst.msk [vmem:[%s1059_s14 + $0x77] sm:$0x1] %vm296_vm0, %v543_v45 }
  0xa2   : > { %792 = vst.msk [vmem:[%s1059_s14 + $0x7b] sm:$0x1] %vm296_vm0, %v544_v46 }
  0xa3   : > { %793 = vst.msk [vmem:[%s1059_s14 + $0x7f] sm:$0x1] %vm296_vm0, %v545_v47 }
  0xa4 PF: > { %s14_s11 = sadd.s32 1, %s935_s11   ;;  %s1525_s6 = smov %s919_s7 }
  0xa5   : > { %p11_p0 = scmp.ge.s32.totalorder %s14_s11, 4   ;;  %s1526_s7 = smov %s923_s8 }
  0xa6   : > { %s1527_s8 = smov %s998_s18  ;;  %s1528_s9 = smov %s931_s10 }
  0xa7   : > { %s1529_s10 = smov %s1531_s13  ;;  %13 = sbr.rel (!%p11_p0) target bundleno = 4 (0x4), region = 68 }
  0xac   :  { %638 = vsyncpa [#allocation3], 1 }
  0xad   :  { %640 = vsyncpa [#allocation3 + $0x1], 1 }

</bundles_post_ra>
